<compile_context>
chip_gen: v6e
topology: v6e:2x2x1
jax: 0.10.0
libtpu: 0.0.40
codegen_flags: <defaults>
</compile_context>

<pallas_src>
import numpy as np
import jax
import jax.numpy as jnp
from jax import lax
from jax.experimental import pallas as pl
from jax.experimental.pallas import tpu as pltpu

NEWTON_ITERATIONS = 9000        # matches newton_method(iteration=9000)
NEWTON_CONVERGENCE = 1e-4       # matches convergence=0.0001
GRAD_CLAMP_MIN = 1e-4           # matches torch.clamp(grad, min=0.0001)
CHECK_EVERY = 4                 # Newton steps between convergence checks (9000 % 4 == 0)
assert NEWTON_ITERATIONS % CHECK_EVERY == 0

_LANE_CAP = 2048                # max lane width after the wrapper-side fold
_ROW_TILE_CAP = 256             # max sublane rows per grid step (elementwise kernels)


# ----------------------------- flow math (used inside kernels) -----------------------------
# params is a tuple of (softplus(a_k), softplus(b_k), c_k) Python floats baked as immediates.

def _fwd_val(x, params):
    """forward(x) = sum_k sa_k * log(exp(sb_k*(x+c_k)) + 1), numerically stable."""
    res = jnp.zeros_like(x)
    for sa, sb, c in params:
        z = sb * (x + c)
        res = res + sa * (jnp.maximum(z, 0.0) + jnp.log(1.0 + jnp.exp(-jnp.abs(z))))
    return res


def _fwd_val_grad(x, params, approx_recip):
    """forward(x) and d forward/dx, sharing a single exp per element per k."""
    val = jnp.zeros_like(x)
    grd = jnp.zeros_like(x)
    for sa, sb, c in params:
        z = sb * (x + c)
        e = jnp.exp(-jnp.abs(z))                       # one EUP exp, shared
        val = val + sa * (jnp.maximum(z, 0.0) + jnp.log(1.0 + e))
        denom = 1.0 + e
        r = pl.reciprocal(denom, approx=True) if approx_recip else 1.0 / denom
        sig = jnp.where(z >= 0.0, r, e * r)            # sigmoid(z)
        grd = grd + (sa * sb) * sig
    return val, grd


# ----------------------------------- Pallas kernels -----------------------------------

def make_forward_kernel(params):
    def kernel(x_ref, o_ref):
        o_ref[...] = _fwd_val(x_ref[...], params)
    return kernel


def make_forward_grad_kernel(params):
    # TODO(synk): torch.autograd.grad(create_graph=True) replaced by the analytic derivative.
    def kernel(x_ref, o_ref):
        _, g = _fwd_val_grad(x_ref[...], params, approx_recip=False)
        o_ref[...] = g
    return kernel


def make_forward_with_grad_kernel(params):
    def kernel(x_ref, y_ref, g_ref):
        v, g = _fwd_val_grad(x_ref[...], params, approx_recip=False)
        y_ref[...] = v
        g_ref[...] = g
    return kernel


def make_inverse_kernel(params):
    """Newton–Raphson inversion, whole tensor in one block so the convergence test
    mean(|x_new - x_prev|) < eps is a *global* mean, as in the PyTorch reference.
    Also emits d inverse(f)/d f = 1 / clamp(forward'(x_converged)).
    # TODO(synk): the torch.isnan checks + RuntimeError raise have no in-kernel equivalent.
    """
    def kernel(f_ref, x_out_ref, dxdf_ref):
        f = f_ref[...]
        x0 = jnp.ones_like(f)                          # torch.ones_like(f) initial guess

        def cond(carry):
            it, _x, delta = carry
            return jnp.logical_and(it < NEWTON_ITERATIONS, delta >= NEWTON_CONVERGENCE)

        def body(carry):
            it, x, _ = carry
            x_prev = x
            # CHECK_EVERY unrolled Newton updates per cross-lane mean / scalar sync.
            for _ in range(CHECK_EVERY):
                x_prev = x
                val, grd = _fwd_val_grad(x, params, approx_recip=True)
                grd = jnp.maximum(grd, GRAD_CLAMP_MIN)        # clamp(min=1e-4)
                x = x - (val - f) * pl.reciprocal(grd, approx=True)
            delta = jnp.mean(jnp.abs(x - x_prev))
            return it + jnp.int32(CHECK_EVERY), x, delta

        init = (jnp.int32(0), x0, jnp.float32(jnp.inf))
        _, x_fin, _ = lax.while_loop(cond, body, init)

        # Recompute the derivative once at the converged x (exact sigmoid / exact divide).
        _, g_fin = _fwd_val_grad(x_fin, params, approx_recip=False)
        g_fin = jnp.maximum(g_fin, GRAD_CLAMP_MIN)

        x_out_ref[...] = x_fin
        dxdf_ref[...] = 1.0 / g_fin
    return kernel


# ----------------------------------- layout helpers -----------------------------------

def _fold_2d(total):
    """Fold a flat elementwise tensor into (R, C): R a multiple of 8 (full sublane
    occupancy), C a lane-dense multiple of 128 (unmasked vector stores)."""
    assert total % (8 * 128) == 0, "tensor size must be a multiple of 1024"
    C = 128
    while C < _LANE_CAP and total % (2 * C) == 0 and (total // (2 * C)) % 8 == 0:
        C *= 2
    return total // C, C


def _row_tile(R):
    if R <= _ROW_TILE_CAP:
        return R
    t = _ROW_TILE_CAP
    while R % t != 0:
        t -= 8
    return t


# ----------------------------------- wrapper -----------------------------------

class LogExpFlowPallas:
    """Pallas implementation of LogExpFlow (positive forcing flow)."""

    def __init__(self, init_a: np.ndarray, init_b: np.ndarray, init_c: np.ndarray):
        init_a = np.asarray(init_a, dtype=np.float64)
        init_b = np.asarray(init_b, dtype=np.float64)
        init_c = np.asarray(init_c, dtype=np.float64)
        assert init_a.shape == init_b.shape == init_c.shape and init_a.ndim == 1
        self.K = init_a.shape[0]
        sa = np.logaddexp(0.0, init_a)   # softplus(a_k)
        sb = np.logaddexp(0.0, init_b)   # softplus(b_k)
        # Baked as Python-float closure constants -> Mosaic immediates, no SMEM loads.
        self.params = tuple((float(sa[k]), float(sb[k]), float(init_c[k]))
                            for k in range(self.K))
        self._fwd_kernel = make_forward_kernel(self.params)
        self._fwd_grad_kernel = make_forward_grad_kernel(self.params)
        self._fwd_wg_kernel = make_forward_with_grad_kernel(self.params)
        self._inv_kernel = make_inverse_kernel(self.params)

    # -------- elementwise kernels (forward / forward_grad / fused) --------
    def _elementwise(self, kernel, f, n_out):
        orig_shape = f.shape
        R, C = _fold_2d(int(np.prod(orig_shape)))
        x2 = jnp.asarray(f, jnp.float32).reshape(R, C)
        rt = _row_tile(R)
        blk = pl.BlockSpec((rt, C), lambda i: (i, 0))
        out_sd = jax.ShapeDtypeStruct((R, C), jnp.float32)
        if n_out == 1:
            out_shape, out_specs = out_sd, blk
        else:
            out_shape = tuple(out_sd for _ in range(n_out))
            out_specs = tuple(pl.BlockSpec((rt, C), lambda i: (i, 0))
                              for _ in range(n_out))
        res = pl.pallas_call(
            kernel,
            out_shape=out_shape,
            grid_spec=pltpu.PrefetchScalarGridSpec(
                num_scalar_prefetch=0,
                grid=(R // rt,),
                in_specs=[blk],
                out_specs=out_specs,
            ),
            compiler_params=pltpu.CompilerParams(dimension_semantics=("parallel",)),
        )(x2)
        if n_out == 1:
            return res.reshape(orig_shape)
        return tuple(r.reshape(orig_shape) for r in res)

    def forward(self, f0, X=None):
        return self._elementwise(self._fwd_kernel, f0, 1)

    def forward_grad(self, f):
        return self._elementwise(self._fwd_grad_kernel, f, 1)

    def forward_with_grad(self, f):
        """Fused value + derivative: one HBM read, one exp per element per k."""
        return self._elementwise(self._fwd_wg_kernel, f, 2)

    # -------- Newton inverse --------
    def _inverse_with_grad(self, f):
        orig_shape = f.shape
        R, C = _fold_2d(int(np.prod(orig_shape)))
        # Whole tensor in one block so the stopping criterion is the global mean.
        # TODO(synk): for tensors that do not fit v7x's 64 MiB VMEM, tile the inverse over
        # row blocks / both TensorCores (changes the criterion to a per-tile mean).
        assert R * C * 4 * 12 <= 24 * 1024 * 1024, "inverse tensor too large for one VMEM block"
        f2 = jnp.asarray(f, jnp.float32).reshape(R, C)
        full = pl.BlockSpec((R, C), lambda i: (0, 0))
        x_inv, dxdf = pl.pallas_call(
            self._inv_kernel,
            out_shape=(jax.ShapeDtypeStruct((R, C), jnp.float32),
                       jax.ShapeDtypeStruct((R, C), jnp.float32)),
            grid_spec=pltpu.PrefetchScalarGridSpec(
                num_scalar_prefetch=0,
                grid=(1,),
                in_specs=[full],
                out_specs=(pl.BlockSpec((R, C), lambda i: (0, 0)),
                           pl.BlockSpec((R, C), lambda i: (0, 0))),
            ),
            compiler_params=pltpu.CompilerParams(
                dimension_semantics=("arbitrary",),
                vmem_limit_bytes=32 * 1024 * 1024,
            ),
        )(f2)
        return x_inv.reshape(orig_shape), dxdf.reshape(orig_shape)

    def inverse(self, f):
        return self._inverse_with_grad(f)[0]

    def inverse_grad(self, f):
        return self._inverse_with_grad(f)[1]

    def KLD(self):
        return 0.0


# ----------------------------------- main -----------------------------------

if __name__ == "__main__":
    key = jax.random.PRNGKey(0)
    B, T = 2, 512
    f0 = jax.random.normal(key, (B, T), dtype=jnp.float32)

    init_a = np.array([0.5, 0.3, -0.1], dtype=np.float32)
    init_b = np.array([0.4, -0.2, 0.6], dtype=np.float32)
    init_c = np.array([0.0, 0.5, -0.3], dtype=np.float32)
    flow = LogExpFlowPallas(init_a, init_b, init_c)

    # numpy reference (same baked parameters)
    f0_np = np.asarray(f0, dtype=np.float64)
    y_ref = np.zeros_like(f0_np)
    g_ref = np.zeros_like(f0_np)
    for sa_k, sb_k, c_k in flow.params:
        z = sb_k * (f0_np + c_k)
        y_ref += sa_k * np.log1p(np.exp(z))
        g_ref += sa_k * sb_k / (1.0 + np.exp(-z))

    # forward
    y = jax.block_until_ready(flow.forward(f0))
    assert np.allclose(np.asarray(y), y_ref, rtol=1e-5, atol=1e-5), "forward mismatch"

    # forward_grad
    g = jax.block_until_ready(flow.forward_grad(f0))
    assert np.allclose(np.asarray(g), g_ref, rtol=1e-5, atol=1e-5), "forward_grad mismatch"

    # fused forward + grad
    y2, g2 = flow.forward_with_grad(f0)
    jax.block_until_ready((y2, g2))
    assert np.allclose(np.asarray(y2), y_ref, rtol=1e-5, atol=1e-5), "fused value mismatch"
    assert np.allclose(np.asarray(g2), g_ref, rtol=1e-5, atol=1e-5), "fused grad mismatch"

    # inverse via in-kernel Newton–Raphson: inverse(forward(f0)) ≈ f0
    x_rec, dxdf = flow._inverse_with_grad(y)
    jax.block_until_ready((x_rec, dxdf))
    assert np.allclose(np.asarray(x_rec), f0_np, atol=1e-2), "inverse mismatch"

    # inverse_grad ≈ 1 / forward'(x*)
    assert np.allclose(np.asarray(dxdf), 1.0 / g_ref, atol=1e-2), "inverse_grad mismatch"

    # KLD is a constant 0.0
    assert flow.KLD() == 0.0

    print("KERNEL_OK")
</pallas_src>

<mosaic_0001>
module attributes {stable_mosaic.version = 11 : i64} {
  func.func @kernel(%arg0: i32, %arg1: memref<8x128xf32, #tpu.memory_space<vmem>>, %arg2: memref<8x128xf32, #tpu.memory_space<vmem>>) attributes {dimension_semantics = [#tpu.dimension_semantics<parallel>], iteration_bounds = array<i64: 1>, scalar_prefetch = 0 : i64, scratch_operands = 0 : i64, tpu.core_type = #tpu.core_type<tc>, window_params = [{transform_indices = @transform_0, window_bounds = array<i64: 8, 128>}, {transform_indices = @transform_1, window_bounds = array<i64: 8, 128>}]} {
    %c0 = arith.constant 0 : index
    %c0_0 = arith.constant 0 : index
    %0 = vector.load %arg1[%c0, %c0_0] : memref<8x128xf32, #tpu.memory_space<vmem>>, vector<8x128xf32>
    %cst = arith.constant 0.000000e+00 : f32
    %1 = vector.broadcast %cst : f32 to vector<8x128xf32>
    %cst_1 = arith.constant 0.000000e+00 : f32
    %2 = vector.broadcast %cst_1 : f32 to vector<8x128xf32>
    %3 = arith.addf %0, %2 : vector<8x128xf32>
    %cst_2 = arith.constant 0.913015246 : f32
    %4 = vector.broadcast %cst_2 : f32 to vector<8x128xf32>
    %5 = arith.mulf %4, %3 : vector<8x128xf32>
    %cst_3 = arith.constant 0.000000e+00 : f32
    %6 = vector.broadcast %cst_3 : f32 to vector<8x128xf32>
    %7 = arith.maximumf %5, %6 : vector<8x128xf32>
    %8 = math.absf %5 : vector<8x128xf32>
    %cst_4 = arith.constant 0.000000e+00 : f32
    %9 = vector.broadcast %cst_4 : f32 to vector<8x128xf32>
    %10 = arith.subf %9, %8 : vector<8x128xf32>
    %11 = math.exp %10 : vector<8x128xf32>
    %cst_5 = arith.constant 1.000000e+00 : f32
    %12 = vector.broadcast %cst_5 : f32 to vector<8x128xf32>
    %13 = arith.addf %12, %11 : vector<8x128xf32>
    %14 = math.log %13 : vector<8x128xf32>
    %15 = arith.addf %7, %14 : vector<8x128xf32>
    %cst_6 = arith.constant 0.974076986 : f32
    %16 = vector.broadcast %cst_6 : f32 to vector<8x128xf32>
    %17 = arith.mulf %16, %15 : vector<8x128xf32>
    %18 = arith.addf %1, %17 : vector<8x128xf32>
    %cst_7 = arith.constant 5.000000e-01 : f32
    %19 = vector.broadcast %cst_7 : f32 to vector<8x128xf32>
    %20 = arith.addf %0, %19 : vector<8x128xf32>
    %cst_8 = arith.constant 0.598138869 : f32
    %21 = vector.broadcast %cst_8 : f32 to vector<8x128xf32>
    %22 = arith.mulf %21, %20 : vector<8x128xf32>
    %cst_9 = arith.constant 0.000000e+00 : f32
    %23 = vector.broadcast %cst_9 : f32 to vector<8x128xf32>
    %24 = arith.maximumf %22, %23 : vector<8x128xf32>
    %25 = math.absf %22 : vector<8x128xf32>
    %cst_10 = arith.constant 0.000000e+00 : f32
    %26 = vector.broadcast %cst_10 : f32 to vector<8x128xf32>
    %27 = arith.subf %26, %25 : vector<8x128xf32>
    %28 = math.exp %27 : vector<8x128xf32>
    %cst_11 = arith.constant 1.000000e+00 : f32
    %29 = vector.broadcast %cst_11 : f32 to vector<8x128xf32>
    %30 = arith.addf %29, %28 : vector<8x128xf32>
    %31 = math.log %30 : vector<8x128xf32>
    %32 = arith.addf %24, %31 : vector<8x128xf32>
    %cst_12 = arith.constant 0.854355275 : f32
    %33 = vector.broadcast %cst_12 : f32 to vector<8x128xf32>
    %34 = arith.mulf %33, %32 : vector<8x128xf32>
    %35 = arith.addf %18, %34 : vector<8x128xf32>
    %cst_13 = arith.constant -3.000000e-01 : f32
    %36 = vector.broadcast %cst_13 : f32 to vector<8x128xf32>
    %37 = arith.addf %0, %36 : vector<8x128xf32>
    %cst_14 = arith.constant 1.03748798 : f32
    %38 = vector.broadcast %cst_14 : f32 to vector<8x128xf32>
    %39 = arith.mulf %38, %37 : vector<8x128xf32>
    %cst_15 = arith.constant 0.000000e+00 : f32
    %40 = vector.broadcast %cst_15 : f32 to vector<8x128xf32>
    %41 = arith.maximumf %39, %40 : vector<8x128xf32>
    %42 = math.absf %39 : vector<8x128xf32>
    %cst_16 = arith.constant 0.000000e+00 : f32
    %43 = vector.broadcast %cst_16 : f32 to vector<8x128xf32>
    %44 = arith.subf %43, %42 : vector<8x128xf32>
    %45 = math.exp %44 : vector<8x128xf32>
    %cst_17 = arith.constant 1.000000e+00 : f32
    %46 = vector.broadcast %cst_17 : f32 to vector<8x128xf32>
    %47 = arith.addf %46, %45 : vector<8x128xf32>
    %48 = math.log %47 : vector<8x128xf32>
    %49 = arith.addf %41, %48 : vector<8x128xf32>
    %cst_18 = arith.constant 0.644396663 : f32
    %50 = vector.broadcast %cst_18 : f32 to vector<8x128xf32>
    %51 = arith.mulf %50, %49 : vector<8x128xf32>
    %52 = arith.addf %35, %51 : vector<8x128xf32>
    %c0_19 = arith.constant 0 : index
    %c0_20 = arith.constant 0 : index
    %53 = vector.load %arg2[%c0_19, %c0_20] : memref<8x128xf32, #tpu.memory_space<vmem>>, vector<8x128xf32>
    tpu.vector_store %arg2[%c0_19, %c0_20], %52 {strides = array<i32>} : memref<8x128xf32, #tpu.memory_space<vmem>>, vector<8x128xf32>,
    return
  }
  func.func @transform_0(%arg0: i32) -> (i32, i32) {
    %c0_i32 = arith.constant 0 : i32
    %c0_i32_0 = arith.constant 0 : i32
    return %arg0, %c0_i32 : i32, i32
  }
  func.func @transform_1(%arg0: i32) -> (i32, i32) {
    %c0_i32 = arith.constant 0 : i32
    %c0_i32_0 = arith.constant 0 : i32
    return %arg0, %c0_i32 : i32, i32
  }
}

</mosaic_0001>

<bundles_post_ra>
// kernel: tpu_custom_call.1
= control target key start
LH: loop header
LB: loop body
LE: loop exit
PB: predicated region body
PF: predicated region fallthrough
CT: control target
= control target key end

     0   :  { %6 = vsyncpa [#allocation3], 0  ;;  %s153_s0 = inlined_call_operand.hbm [shape: f32[8,128], index: 0, kind: input, shape index: {}]   ;;  %s154_s1 = inlined_call_operand.hbm [shape: f32[8,128], index: 1, kind: output, shape index: {}]  }
   0x1   :  { %7 = vsyncpa [#allocation4], 0  ;;  %s135_s6 = smov [#allocation2]  }
   0x2   :  { %s14_s7 = sshll.u32 %s135_s6, 4  ;;  %s15_s7 = int_to_ptr.vmem [resolvable:$true] %s14_s7 }
   0x3   :  { %s99_s8 = scalar_lea.vmem %s15_s7, 128  ;;  %p104_p1 = scmp.lt.s32.totalorder %s15_s7, %s15_s7 }
   0x4   :  { %p100_p0 = scmp.ne.s32.totalorder %s15_s7, %s99_s8  ;;  %p105_p2 = scmp.lt.s32.totalorder %s99_s8, %s99_s8 }
   0x6   :  { %p106_p3 = por %p105_p2, %p104_p1 }
   0x8   :  { %p107_p4 = pnand %p106_p3, %p100_p0 }
   0xa   :  { %110 = shalt.err (!%p107_p4)
}
   0xb   :  { %17 = dma.hbm_to_vmem [thread:$0]  %s153_s0, 128, %s15_s7, [#allocation3]  }
   0xc   :  { %131 = dma.done.wait [#allocation3], 128  }
   0xd   :  { %132 = vsyncadd [#allocation3], 4294967168  ;;  %v21_v0 = vld [vmem:[#allocation2] sm:$0xff]  ;;  %s136_s0 = smov [#allocation5]  }
   0xe   :  { %v23_v1 = vmul.f32 0.91301525, %v21_v0  ;;  %v35_v2 = vadd.f32 0.5, %v21_v0  ;;  %v48_v3 = vadd.f32 -0.3, %v21_v0  ;;  %s68_s11 = sshll.u32 %s136_s0, 4  ;;  %s69_s11 = int_to_ptr.vmem [resolvable:$true] %s68_s11 }
   0xf   :  { %s111_s12 = scalar_lea.vmem %s69_s11, 128  ;;  %p116_p6 = scmp.lt.s32.totalorder %s69_s11, %s69_s11 }
  0x10   :  { %v25_v4 = vand.u32 2147483647, %v23_v1  ;;  %v36_v5 = vmul.f32 0.59813887, %v35_v2  ;;  %v49_v6 = vmul.f32 1.037488, %v48_v3  ;;  %p112_p5 = scmp.ne.s32.totalorder %s69_s11, %s111_s12  ;;  %p117_p7 = scmp.lt.s32.totalorder %s111_s12, %s111_s12 }
  0x11   :  { %v24_v21 = vmax.f32 %v23_v1, 0.0 }
  0x12   :  { %v26_v7 = vsub.f32 0.0, %v25_v4  ;;  %v38_v8 = vand.u32 2147483647, %v36_v5  ;;  %v51_v9 = vand.u32 2147483647, %v49_v6  ;;  %v37_v24 = vmax.f32 %v36_v5, 0.0  ;;  %p118_p8 = por %p117_p7, %p116_p6 }
  0x13   :  { %v50_v26 = vmax.f32 %v49_v6, 0.0 }
  0x14   :  { %v27_v10 = vmul.f32 1.442695, %v26_v7  ;;  %v39_v11 = vsub.f32 0.0, %v38_v8  ;;  %v52_v12 = vsub.f32 0.0, %v51_v9  ;;  %p119_p9 = pnand %p118_p8, %p112_p5 }
  0x16   :  { %79 = vpow2.f32 %v27_v10  ;;  %v40_v13 = vmul.f32 1.442695, %v39_v11  ;;  %v53_v14 = vmul.f32 1.442695, %v52_v12 }
  0x18   :  { %81 = vpow2.f32 %v40_v13 }
  0x19   :  { %83 = vpow2.f32 %v53_v14 }
  0x23   :  { %v80_v15 = vpop.eup %79 }
  0x24   :  { %v29_v16 = vadd.f32 1.0, %v80_v15 }
  0x25   :  { %v82_v17 = vpop.eup %81 }
  0x26   :  { %v84_v18 = vpop.eup %83  ;;  %85 = vlog2.f32 %v29_v16  ;;  %v42_v19 = vadd.f32 1.0, %v82_v17 }
  0x27   :  { %v55_v20 = vadd.f32 1.0, %v84_v18 }
  0x28   :  { %87 = vlog2.f32 %v42_v19 }
  0x29   :  { %89 = vlog2.f32 %v55_v20 }
  0x33   :  { %v86_v22 = vpop.eup %85 }
  0x34   :  { %v31_v23 = vmul.f32 0.6931472, %v86_v22 }
  0x35   :  { %v88_v25 = vpop.eup %87 }
  0x36   :  { %v90_v27 = vpop.eup %89  ;;  %v32_v28 = vadd.f32 %v31_v23, %v24_v21  ;;  %v44_v29 = vmul.f32 0.6931472, %v88_v25 }
  0x37   :  { %v57_v30 = vmul.f32 0.6931472, %v90_v27 }
  0x38   :  { %v33_v31 = vmul.f32 0.974077, %v32_v28  ;;  %v45_v32 = vadd.f32 %v44_v29, %v37_v24 }
  0x39   :  { %v58_v33 = vadd.f32 %v57_v30, %v50_v26 }
  0x3a   :  { %v46_v34 = vmul.f32 0.8543553, %v45_v32 }
  0x3b   :  { %v59_v35 = vmul.f32 0.64439666, %v58_v33 }
  0x3c   :  { %v47_v36 = vadd.f32 %v46_v34, %v33_v31 }
  0x3e   :  { %v60_v37 = vadd.f32 %v59_v35, %v47_v36 }
  0x40   :  { %61 = vst [vmem:[#allocation5] sm:$0xff] %v60_v37 }
  0x41   :  { %122 = shalt.err (!%p119_p9)
}
  0x42   :  { %71 = dma.vmem_to_hbm [thread:$0]  %s69_s11, 128, %s154_s1, [#allocation4]  }
  0x43   :  { %133 = dma.done.wait [#allocation4], 128  }
  0x44   :  { %134 = vsyncadd [#allocation4], 4294967168 }
  0x45   :  { %75 = vsyncpa [#allocation3], 1 }
  0x46   :  { %76 = vsyncpa [#allocation4], 1 }

</bundles_post_ra>
